<compile_context>
chip_gen: v7x
topology: tpu7x:2x2x1
jax: 0.10.0
libtpu: 0.0.40
codegen_flags: <defaults>
</compile_context>

<pallas_src>
import functools

import jax
import jax.numpy as jnp
from jax.experimental import pallas as pl
from jax.experimental.pallas import tpu as pltpu


def _round_up(v: int, m: int) -> int:
    return ((v + m - 1) // m) * m


def _gsage_kernel(x_ref, adj_ref, w_ref, b_ref, o_ref, *,
                  f_out: int, add_self: bool, mean: bool, use_bn: bool):
    # Per grid step:
    #   x_ref  : (B, N, F_in)     full node features (resident across steps)
    #   adj_ref: (B, TILE_N, N)   row tile of the adjacency
    #   w_ref  : (F_in, F_pad)    weights, zero-padded to a multiple of 128 lanes
    #   b_ref  : (1, F_pad)       bias, zero-padded
    #   o_ref  : (B, TILE_N, F_pad)
    b_sz, tile_n, _ = adj_ref.shape
    f_pad = w_ref.shape[-1]

    adj = adj_ref[...]            # stays in stored dtype (f32 or bf16)
    x = x_ref[...]

    # --- neighborhood aggregation on the MXU (f32 accumulation) ---
    h_k_n = jnp.einsum("bij,bjf->bif", adj, x,
                       preferred_element_type=jnp.float32)   # (B, TILE_N, F_in)

    if add_self:
        # (adj + I) @ x == adj @ x + x[rows of this node tile]
        row0 = pl.multiple_of(pl.program_id(0) * tile_n, tile_n)
        x_tile = x_ref[:, pl.ds(row0, tile_n), :].astype(jnp.float32)
        h_k_n = h_k_n + x_tile

    if mean:
        # Scale after aggregation instead of dividing the (B, N, N) adjacency.
        row_sum = jnp.sum(adj, axis=-1, keepdims=True, dtype=jnp.float32)
        if add_self:
            row_sum = row_sum + 1.0
        h_k_n = h_k_n * (1.0 / row_sum)

    # --- linear layer as one tall-skinny 2D matmul ---
    w = w_ref[...]
    h2d = h_k_n.reshape(b_sz * tile_n, h_k_n.shape[-1]).astype(w.dtype)
    h = jnp.dot(h2d, w, preferred_element_type=jnp.float32)
    h = h + b_ref[...].astype(jnp.float32)          # (B*TILE_N, F_pad)
    h = h.reshape(b_sz, tile_n, f_pad)

    # --- F.normalize(h, dim=2, p=2):  h / max(||h||, 1e-12)  via rsqrt/EUP ---
    # Padded lanes are exactly zero (zero W columns / bias), so they do not
    # perturb the sum of squares.
    sumsq = jnp.sum(h * h, axis=-1, keepdims=True)
    h = h * jax.lax.rsqrt(jnp.maximum(sumsq, 1e-24))

    # --- ReLU ---
    h = jnp.maximum(h, 0.0)

    if use_bn:
        # BatchNorm1d(num_features=N), training mode, weight=1 / bias=0:
        # per-node stats over (batch, feature).  Padded lanes contribute 0 to
        # the sums; divide by the true count and mask them out of the variance.
        count = b_sz * f_out
        mu = jnp.sum(h, axis=(0, 2), keepdims=True) * (1.0 / count)
        diff = h - mu
        if f_pad != f_out:
            lane = jax.lax.broadcasted_iota(jnp.int32, h.shape, 2)
            diff = jnp.where(lane < f_out, diff, 0.0)
        var = jnp.sum(diff * diff, axis=(0, 2), keepdims=True) * (1.0 / count)
        h = (h - mu) * jax.lax.rsqrt(var + 1e-5)

    o_ref[...] = h.astype(o_ref.dtype)


def batched_graph_sage(x, adj, w, b, *,
                       add_self=False, mean=False, use_bn=True,
                       tile_n=None, mxu_dtype=None):
    """Pallas TPU forward for BatchedGraphSAGE.

    x: (B, N, F_in), adj: (B, N, N), w: (F_in, F_out), b: (F_out,)
    mxu_dtype: optional (e.g. jnp.bfloat16) dtype for the matmul inputs
               (accumulation stays f32; elementwise tail stays f32).
    """
    B, N, F_in = x.shape
    F_out = w.shape[1]
    assert adj.shape == (B, N, N)
    assert b.shape == (F_out,)

    # Node-tile size: multiple of 8 that divides N (falls back to N).
    if tile_n is None:
        tile_n = N
        for cand in (512, 256, 128, 64, 32, 16, 8):
            if N % cand == 0:
                tile_n = cand
                break
    assert N % tile_n == 0, "tile_n must divide N"

    # Lane-dense parameters / output: pad the feature dim to a multiple of 128.
    f_pad = _round_up(F_out, 128)
    w_p = w
    b_p = b.reshape(1, F_out)
    if f_pad != F_out:
        w_p = jnp.pad(w, ((0, 0), (0, f_pad - F_out)))
        b_p = jnp.pad(b_p, ((0, 0), (0, f_pad - F_out)))

    # Optional bf16 MXU inputs (halves DMA for x/adj, 2x MXU rate on v6e/v7x).
    if mxu_dtype is not None:
        x = x.astype(mxu_dtype)
        adj = adj.astype(mxu_dtype)
        w_p = w_p.astype(mxu_dtype)

    kernel = functools.partial(_gsage_kernel, f_out=F_out,
                               add_self=add_self, mean=mean, use_bn=use_bn)

    def nbytes(a):
        return a.size * a.dtype.itemsize

    # Rough VMEM need: double-buffered adj/out tiles + resident x + params.
    adj_tile_bytes = B * tile_n * N * adj.dtype.itemsize
    out_tile_bytes = B * tile_n * f_pad * 4
    need = (2 * adj_tile_bytes + 2 * out_tile_bytes + nbytes(x)
            + nbytes(w_p) + nbytes(b_p) + (2 << 20))
    vmem_limit = int(min(max(need, 8 << 20), 64 << 20))

    cost = pl.CostEstimate(
        flops=2 * B * N * N * F_in + 2 * B * N * F_in * f_pad,
        transcendentals=2 * B * N,
        bytes_accessed=nbytes(x) + nbytes(adj) + nbytes(w_p) + nbytes(b_p)
        + B * N * f_pad * 4,
    )

    out = pl.pallas_call(
        kernel,
        out_shape=jax.ShapeDtypeStruct((B, N, f_pad), jnp.float32),
        grid=(N // tile_n,),
        in_specs=[
            pl.BlockSpec((B, N, F_in), lambda i: (0, 0, 0)),    # x (resident)
            pl.BlockSpec((B, tile_n, N), lambda i: (0, i, 0)),  # adj row tile
            pl.BlockSpec((F_in, f_pad), lambda i: (0, 0)),      # W
            pl.BlockSpec((1, f_pad), lambda i: (0, 0)),         # bias
        ],
        out_specs=pl.BlockSpec((B, tile_n, f_pad), lambda i: (0, i, 0)),
        compiler_params=pltpu.CompilerParams(
            dimension_semantics=("parallel",),
            vmem_limit_bytes=vmem_limit),
        cost_estimate=cost,
    )(x, adj, w_p, b_p)

    if f_pad != F_out:
        out = out[..., :F_out]
    return out


def _reference(x, adj, w, b, *, add_self=False, mean=False, use_bn=True):
    x = x.astype(jnp.float32)
    adj = adj.astype(jnp.float32)
    if add_self:
        adj = adj + jnp.eye(adj.shape[-1], dtype=jnp.float32)[None]
    if mean:
        adj = adj / jnp.sum(adj, axis=-1, keepdims=True)
    h = jnp.einsum("bij,bjf->bif", adj, x)
    h = jnp.einsum("bif,fo->bio", h, w) + b[None, None, :]
    norm = jnp.linalg.norm(h, axis=-1, keepdims=True)
    h = h / jnp.maximum(norm, 1e-12)
    h = jnp.maximum(h, 0.0)
    if use_bn:
        mu = jnp.mean(h, axis=(0, 2), keepdims=True)
        var = jnp.mean((h - mu) ** 2, axis=(0, 2), keepdims=True)
        h = (h - mu) / jnp.sqrt(var + 1e-5)
    return h


if __name__ == "__main__":
    # Small deterministic example shapes.
    B, N, F_IN, F_OUT = 2, 16, 32, 32

    key = jax.random.PRNGKey(0)
    k_x, k_adj, k_w, k_b = jax.random.split(key, 4)

    x = jax.random.normal(k_x, (B, N, F_IN), dtype=jnp.float32)
    adj_raw = (jax.random.uniform(k_adj, (B, N, N)) > 0.5).astype(jnp.float32)
    adj = jnp.maximum(adj_raw, jnp.swapaxes(adj_raw, 1, 2))

    # Parameter init mirroring the module's __init__:
    #   W.weight: xavier_uniform, gain = calculate_gain('relu') = sqrt(2)
    #   W.bias:   nn.Linear default uniform(-1/sqrt(fan_in), 1/sqrt(fan_in))
    gain = jnp.sqrt(2.0)
    bound_w = gain * jnp.sqrt(6.0 / (F_IN + F_OUT))
    w = jax.random.uniform(k_w, (F_IN, F_OUT), minval=-bound_w, maxval=bound_w,
                           dtype=jnp.float32)
    bound_b = 1.0 / jnp.sqrt(jnp.float32(F_IN))
    b = jax.random.uniform(k_b, (F_OUT,), minval=-bound_b, maxval=bound_b,
                           dtype=jnp.float32)

    # 1) Default config (use_bn=True, mean=False, add_self=False), f32 MXU path.
    out = batched_graph_sage(x, adj, w, b)
    out = jax.block_until_ready(out)
    ref = _reference(x, adj, w, b)
    assert out.shape == (B, N, F_OUT)
    assert jnp.allclose(out, ref, rtol=1e-4, atol=1e-4)

    # 2) add_self / mean branches (no BN), f32 MXU path.
    out2 = jax.block_until_ready(
        batched_graph_sage(x, adj, w, b, add_self=True, mean=True, use_bn=False))
    ref2 = _reference(x, adj, w, b, add_self=True, mean=True, use_bn=False)
    assert jnp.allclose(out2, ref2, rtol=1e-4, atol=1e-4)

    # 3) bf16 MXU inputs (f32 accumulation) — looser tolerance by design.
    out3 = jax.block_until_ready(
        batched_graph_sage(x, adj, w, b, mxu_dtype=jnp.bfloat16))
    assert jnp.allclose(out3, ref, rtol=0.15, atol=0.15)

    print("KERNEL_OK")
</pallas_src>

<mosaic_0001>
module attributes {stable_mosaic.version = 11 : i64} {
  func.func @_gsage_kernel(%arg0: i32, %arg1: memref<2x16x32xf32, #tpu.memory_space<vmem>>, %arg2: memref<2x16x16xf32, #tpu.memory_space<vmem>>, %arg3: memref<32x128xf32, #tpu.memory_space<vmem>>, %arg4: memref<1x128xf32, #tpu.memory_space<vmem>>, %arg5: memref<2x16x128xf32, #tpu.memory_space<vmem>>) attributes {dimension_semantics = [#tpu.dimension_semantics<parallel>], iteration_bounds = array<i64: 1>, scalar_prefetch = 0 : i64, scratch_operands = 0 : i64, tpu.core_type = #tpu.core_type<tc>, window_params = [{pipeline_mode = #tpu.pipeline_mode<synchronous>, transform_indices = @transform_0, window_bounds = array<i64: 2, 16, 32>}, {transform_indices = @transform_1, window_bounds = array<i64: 2, 16, 16>}, {pipeline_mode = #tpu.pipeline_mode<synchronous>, transform_indices = @transform_2, window_bounds = array<i64: 32, 128>}, {pipeline_mode = #tpu.pipeline_mode<synchronous>, transform_indices = @transform_3, window_bounds = array<i64: 1, 128>}, {transform_indices = @transform_4, window_bounds = array<i64: 2, 16, 128>}]} {
    %c0 = arith.constant 0 : index
    %c0_0 = arith.constant 0 : index
    %c0_1 = arith.constant 0 : index
    %0 = vector.load %arg2[%c0, %c0_0, %c0_1] : memref<2x16x16xf32, #tpu.memory_space<vmem>>, vector<2x16x16xf32>
    %c0_2 = arith.constant 0 : index
    %c0_3 = arith.constant 0 : index
    %c0_4 = arith.constant 0 : index
    %1 = vector.load %arg1[%c0_2, %c0_3, %c0_4] : memref<2x16x32xf32, #tpu.memory_space<vmem>>, vector<2x16x32xf32>
    "tpu.trace_start"() <{level = 10 : i32, message = "bij,bjf->bif"}> : () -> ()
    %cst = arith.constant dense<0.000000e+00> : vector<2x16x32xf32>
    %2 = tpu.matmul %0, %1, %cst {dimension_numbers = #tpu.dot_dimension_numbers<[2], [1], [1], [2], [0, 0, 0, 1, 1, 2], [0], [0]>} : vector<2x16x16xf32>, vector<2x16x32xf32>, vector<2x16x32xf32> -> vector<2x16x32xf32>
    "tpu.trace_stop"() : () -> ()
    %c0_5 = arith.constant 0 : index
    %c0_6 = arith.constant 0 : index
    %3 = vector.load %arg3[%c0_5, %c0_6] : memref<32x128xf32, #tpu.memory_space<vmem>>, vector<32x128xf32>
    %4 = vector.shape_cast %2 : vector<2x16x32xf32> to vector<32x32xf32>
    %cst_7 = arith.constant dense<0.000000e+00> : vector<32x128xf32>
    %5 = tpu.matmul %4, %3, %cst_7 {dimension_numbers = #tpu.dot_dimension_numbers<[1], [0], [0], [1], [0, 0, 1, 1], [], []>} : vector<32x32xf32>, vector<32x128xf32>, vector<32x128xf32> -> vector<32x128xf32>
    %c0_8 = arith.constant 0 : index
    %c0_9 = arith.constant 0 : index
    %6 = vector.load %arg4[%c0_8, %c0_9] : memref<1x128xf32, #tpu.memory_space<vmem>>, vector<1x128xf32>
    %7 = vector.broadcast %6 : vector<1x128xf32> to vector<32x128xf32>
    %8 = arith.addf %5, %7 : vector<32x128xf32>
    %9 = vector.shape_cast %8 : vector<32x128xf32> to vector<2x16x128xf32>
    %10 = arith.mulf %9, %9 : vector<2x16x128xf32>
    %cst_10 = arith.constant dense<0.000000e+00> : vector<2x16xf32>
    %11 = vector.multi_reduction <add>, %10, %cst_10 [2] : vector<2x16x128xf32> to vector<2x16xf32>
    %12 = vector.shape_cast %11 : vector<2x16xf32> to vector<2x16x1xf32>
    %cst_11 = arith.constant 1.000000e-24 : f32
    %13 = vector.broadcast %cst_11 : f32 to vector<2x16x1xf32>
    %14 = arith.maximumf %12, %13 : vector<2x16x1xf32>
    %15 = math.rsqrt %14 : vector<2x16x1xf32>
    %16 = vector.broadcast %15 : vector<2x16x1xf32> to vector<2x16x128xf32>
    %17 = arith.mulf %9, %16 : vector<2x16x128xf32>
    %cst_12 = arith.constant 0.000000e+00 : f32
    %18 = vector.broadcast %cst_12 : f32 to vector<2x16x128xf32>
    %19 = arith.maximumf %17, %18 : vector<2x16x128xf32>
    %cst_13 = arith.constant dense<0.000000e+00> : vector<16xf32>
    %20 = vector.multi_reduction <add>, %19, %cst_13 [0, 2] : vector<2x16x128xf32> to vector<16xf32>
    %21 = vector.shape_cast %20 : vector<16xf32> to vector<1x16x1xf32>
    %cst_14 = arith.constant 1.562500e-02 : f32
    %22 = vector.broadcast %cst_14 : f32 to vector<1x16x1xf32>
    %23 = arith.mulf %21, %22 : vector<1x16x1xf32>
    %24 = vector.broadcast %23 : vector<1x16x1xf32> to vector<2x16x128xf32>
    %25 = arith.subf %19, %24 : vector<2x16x128xf32>
    %26 = tpu.iota {dimensions = array<i32: 2>} : vector<2x16x128xi32>
    %c32_i32 = arith.constant 32 : i32
    %27 = vector.broadcast %c32_i32 : i32 to vector<2x16x128xi32>
    %28 = arith.cmpi slt, %26, %27 : vector<2x16x128xi32>
    %cst_15 = arith.constant 0.000000e+00 : f32
    %29 = vector.broadcast %cst_15 : f32 to vector<2x16x128xf32>
    %30 = arith.select %28, %25, %29 : vector<2x16x128xi1>, vector<2x16x128xf32>
    %31 = arith.mulf %30, %30 : vector<2x16x128xf32>
    %cst_16 = arith.constant dense<0.000000e+00> : vector<16xf32>
    %32 = vector.multi_reduction <add>, %31, %cst_16 [0, 2] : vector<2x16x128xf32> to vector<16xf32>
    %33 = vector.shape_cast %32 : vector<16xf32> to vector<1x16x1xf32>
    %cst_17 = arith.constant 1.562500e-02 : f32
    %34 = vector.broadcast %cst_17 : f32 to vector<1x16x1xf32>
    %35 = arith.mulf %33, %34 : vector<1x16x1xf32>
    %36 = vector.broadcast %23 : vector<1x16x1xf32> to vector<2x16x128xf32>
    %37 = arith.subf %19, %36 : vector<2x16x128xf32>
    %cst_18 = arith.constant 9.99999974E-6 : f32
    %38 = vector.broadcast %cst_18 : f32 to vector<1x16x1xf32>
    %39 = arith.addf %35, %38 : vector<1x16x1xf32>
    %40 = math.rsqrt %39 : vector<1x16x1xf32>
    %41 = vector.broadcast %40 : vector<1x16x1xf32> to vector<2x16x128xf32>
    %42 = arith.mulf %37, %41 : vector<2x16x128xf32>
    %c0_19 = arith.constant 0 : index
    %c0_20 = arith.constant 0 : index
    %c0_21 = arith.constant 0 : index
    %43 = vector.load %arg5[%c0_19, %c0_20, %c0_21] : memref<2x16x128xf32, #tpu.memory_space<vmem>>, vector<2x16x128xf32>
    tpu.vector_store %arg5[%c0_19, %c0_20, %c0_21], %42 {strides = array<i32>} : memref<2x16x128xf32, #tpu.memory_space<vmem>>, vector<2x16x128xf32>,
    return
  }
  func.func @transform_0(%arg0: i32) -> (i32, i32, i32) {
    %c0_i32 = arith.constant 0 : i32
    %c0_i32_0 = arith.constant 0 : i32
    %c0_i32_1 = arith.constant 0 : i32
    %c0_i32_2 = arith.constant 0 : i32
    return %c0_i32, %c0_i32_0, %c0_i32_1 : i32, i32, i32
  }
  func.func @transform_1(%arg0: i32) -> (i32, i32, i32) {
    %c0_i32 = arith.constant 0 : i32
    %c0_i32_0 = arith.constant 0 : i32
    %c0_i32_1 = arith.constant 0 : i32
    return %c0_i32, %arg0, %c0_i32_0 : i32, i32, i32
  }
  func.func @transform_2(%arg0: i32) -> (i32, i32) {
    %c0_i32 = arith.constant 0 : i32
    %c0_i32_0 = arith.constant 0 : i32
    %c0_i32_1 = arith.constant 0 : i32
    return %c0_i32, %c0_i32_0 : i32, i32
  }
  func.func @transform_3(%arg0: i32) -> (i32, i32) {
    %c0_i32 = arith.constant 0 : i32
    %c0_i32_0 = arith.constant 0 : i32
    %c0_i32_1 = arith.constant 0 : i32
    return %c0_i32, %c0_i32_0 : i32, i32
  }
  func.func @transform_4(%arg0: i32) -> (i32, i32, i32) {
    %c0_i32 = arith.constant 0 : i32
    %c0_i32_0 = arith.constant 0 : i32
    %c0_i32_1 = arith.constant 0 : i32
    return %c0_i32, %arg0, %c0_i32_0 : i32, i32, i32
  }
}

</mosaic_0001>

<bundles_post_ra>
// kernel: tpu_custom_call.1
= control target key start
LH: loop header
LB: loop body
LE: loop exit
PB: predicated region body
PF: predicated region fallthrough
CT: control target
= control target key end

     0   :  { %9 = vsyncpa [#allocation3], 0  ;;  %s714_s0 = inlined_call_operand.hbm [shape: f32[2,16,32], index: 0, kind: input, shape index: {}]   ;;  %s715_s1 = inlined_call_operand.hbm [shape: f32[2,16,16], index: 1, kind: input, shape index: {}]   ;;  %s716_s2 = inlined_call_operand.hbm [shape: f32[32,128], index: 2, kind: input, shape index: {}]   ;;  %s717_s3 = inlined_call_operand.vmem [shape: f32[1,128], index: 3, kind: input, shape index: {}]   ;;  %s718_s4 = inlined_call_operand.hbm [shape: f32[2,16,128], index: 4, kind: output, shape index: {}]  }
   0x1   :  { %10 = vsyncpa [#allocation6], 0 }
   0x2   :  { %11 = vsyncpa [#allocation4], 0  ;;  %s609_s15 = smov [#allocation5]   ;;  %s610_s17 = smov [#allocation2]  }
   0x3   :  { %s29_s16 = sshll.u32 %s609_s15, 4  ;;  %s17_s18 = sshll.u32 %s610_s17, 4  ;;  %s30_s16 = int_to_ptr.vmem [resolvable:$true] %s29_s16  ;;  %s640_s18 = int_to_ptr.vmem [resolvable:$true] %s17_s18 }
   0x4   :  { %s515_s21 = scalar_lea.hbm %s715_s1, 512 }
   0x5   :  { %p516_p0 = scmp.ne.s32.totalorder %s715_s1, %s515_s21  ;;  %p519_p1 = scmp.lt.u32.totalorder %s515_s21, %s715_s1 }
   0x7   :  { %p521_p2 = pnand %p519_p1, %p516_p0 }
   0x9   :  { %524 = shalt.err (!%p521_p2)
}
   0xa   :  { %s525_s26 = scalar_lea.vmem %s30_s16, 512  ;;  %p530_p4 = scmp.lt.s32.totalorder %s30_s16, %s30_s16 }
   0xb   :  { %p526_p3 = scmp.ne.s32.totalorder %s30_s16, %s525_s26  ;;  %p531_p5 = scmp.lt.s32.totalorder %s525_s26, %s525_s26 }
   0xd   :  { %p532_p6 = por %p531_p5, %p530_p4 }
   0xf   :  { %p533_p7 = pnand %p532_p6, %p526_p3 }
  0x11   :  { %536 = shalt.err (!%p533_p7)
}
  0x12   :  { %s611_s27 = smov 128   ;;  %s612_s28 = smov 8  }
  0x13   :  { %35 = dma.hbm_to_vmem [thread:$0]  %s715_s1, 512, %s30_s16, [#allocation6], %s611_s27, %s611_s27, %s612_s28  }
  0x14   :  { %s537_s7 = scalar_lea.hbm %s714_s0, 512 }
  0x15   :  { %p538_p8 = scmp.ne.s32.totalorder %s714_s0, %s537_s7  ;;  %p541_p9 = scmp.lt.u32.totalorder %s537_s7, %s714_s0 }
  0x17   :  { %p543_p10 = pnand %p541_p9, %p538_p8 }
  0x19   :  { %546 = shalt.err (!%p543_p10)
}
  0x1a   :  { %s547_s12 = scalar_lea.vmem %s640_s18, 512  ;;  %p552_p12 = scmp.lt.s32.totalorder %s640_s18, %s640_s18 }
  0x1b   :  { %p548_p11 = scmp.ne.s32.totalorder %s640_s18, %s547_s12  ;;  %p553_p13 = scmp.lt.s32.totalorder %s547_s12, %s547_s12 }
  0x1d   :  { %p554_p0 = por %p553_p13, %p552_p12 }
  0x1f   :  { %p555_p1 = pnand %p554_p0, %p548_p11 }
  0x21   :  { %558 = shalt.err (!%p555_p1)
}
  0x22   :  { %23 = dma.hbm_to_vmem [thread:$0]  %s714_s0, 512, %s640_s18, [#allocation3], %s611_s27, %s611_s27, %s612_s28  }
  0x23   :  { %s613_s14 = smov [#allocation7]   ;;  %s559_s19 = scalar_lea.hbm %s716_s2, 512 }
  0x24   :  { %s41_s15 = sshll.u32 %s613_s14, 4  ;;  %p560_p2 = scmp.ne.s32.totalorder %s716_s2, %s559_s19  ;;  %s42_s15 = int_to_ptr.vmem [resolvable:$true] %s41_s15 }
  0x25   :  { %p563_p3 = scmp.lt.u32.totalorder %s559_s19, %s716_s2 }
  0x27   :  { %p565_p4 = pnand %p563_p3, %p560_p2 }
  0x29   :  { %568 = shalt.err (!%p565_p4)
}
  0x2a   :  { %s569_s24 = scalar_lea.vmem %s42_s15, 512  ;;  %p574_p6 = scmp.lt.s32.totalorder %s42_s15, %s42_s15 }
  0x2b   :  { %p570_p5 = scmp.ne.s32.totalorder %s42_s15, %s569_s24  ;;  %p575_p7 = scmp.lt.s32.totalorder %s569_s24, %s569_s24 }
  0x2d   :  { %p576_p8 = por %p575_p7, %p574_p6 }
  0x2f   :  { %p577_p9 = pnand %p576_p8, %p570_p5 }
  0x31   :  { %580 = shalt.err (!%p577_p9)
}
  0x32   :  { %47 = dma.hbm_to_vmem [thread:$0]  %s716_s2, 512, %s42_s15, [#allocation6], %s611_s27, %s611_s27, %s612_s28  }
  0x33   :  { %603 = dma.done.wait [#allocation3], 512  }
  0x34   :  { %604 = vsyncadd [#allocation3], 4294966784 }
  0x35   :  { %605 = dma.done.wait [#allocation6], 1024  }
  0x36   :  { %606 = vsyncadd [#allocation6], 4294966272  ;;  %vm67_vm0 = vcmask 130048   ;;  %v63_v0 = vld [vmem:[#allocation2] sm:$0xff]  ;;  %v64_v1 = vld [vmem:[#allocation2 + $0x8] sm:$0xff]  ;;  %vm241_vm1 = vcmask 261120   ;;  %v379_v55 = vlaneseq }
  0x37   :  { %v59_v2 = vld [vmem:[#allocation5] sm:$0xff]  ;;  %v481_v3 = vpack.c.bf16 %v64_v1, %v63_v0  ;;  %v65_v4 = vld [vmem:[#allocation2 + $0x10] sm:$0xff]  ;;  %v66_v5 = vld [vmem:[#allocation2 + $0x18] sm:$0xff] }
  0x38   :  { %457 = vmatprep.mubr.msk.f32.mxu1 %vm67_vm0, %v59_v2  ;;  %v485_v6 = vpack.c.bf16 %v66_v5, %v65_v4  ;;  %v230_v7 = vld [vmem:[#allocation7] sm:$0xff]  ;;  %v231_v8 = vld [vmem:[#allocation7 + $0x8] sm:$0xff]  ;;  %v232_v9 = vld [vmem:[#allocation7 + $0x10] sm:$0xff]  ;;  %v380_v56 = vand.u32 127, %v379_v55 }
  0x39   :  { %482 = vmatprep.subr.bf16.mxu1 %v481_v3  ;;  %v233_v10 = vld [vmem:[#allocation7 + $0x18] sm:$0xff]  ;;  %v60_v11 = vld [vmem:[#allocation5 + $0x8] sm:$0xff]  ;;  %v489_v12 = vpack.c.bf16 %v231_v8, %v230_v7  ;;  %v61_v13 = vld [vmem:[#allocation5 + $0x10] sm:$0xff] }
  0x3a   :  { %484 = vmatpush3.bf16.msra.mxu1 %v481_v3  ;;  %v493_v14 = vpack.c.bf16 %v233_v10, %v232_v9  ;;  %v62_v15 = vld [vmem:[#allocation5 + $0x18] sm:$0xff]  ;;  %v432_v20 = vld [vmem:[%s717_s3] ss:$0 sm:$0xff]  ;;  %vm381_vm2 = vcmp.lt.s32.totalorder %v380_v56, 32  ;;  %s614_s3 = smov [#allocation8]  }
  0x3b   :  { %486 = vmatprep.subr.bf16.mxu1 %v485_v6  ;;  %490 = vmatprep.subr.bf16.mxu0 %v489_v12  ;;  %s415_s26 = sshll.u32 %s614_s3, 4  ;;  %s416_s26 = int_to_ptr.vmem [resolvable:$true] %s415_s26 }
  0x3c   :  { %492 = vmatpush3.bf16.msra.mxu0 %v489_v12  ;;  %s581_s29 = scalar_lea.vmem %s416_s26, 512  ;;  %p586_p11 = scmp.lt.s32.totalorder %s416_s26, %s416_s26 }
  0x3d   :  { %458 = vmatmul.mubr.msk.f32.vlgmr.msra.gmra.mrb[0].mxu1 %vm67_vm0, %v60_v11  ;;  %494 = vmatprep.subr.bf16.mxu0 %v493_v14  ;;  %p582_p10 = scmp.ne.s32.totalorder %s416_s26, %s581_s29  ;;  %p587_p12 = scmp.lt.s32.totalorder %s581_s29, %s581_s29 }
  0x3e   :  { %488 = vmatpush3.bf16.msra.mxu1 %v485_v6  ;;  %464 = vmatprep.mubr.msk.f32.mxu1 %vm67_vm0, %v61_v13 }
  0x3f   :  { %p588_p13 = por %p587_p12, %p586_p11 }
  0x40   :  { %496 = vmatpush3.bf16.msra.mxu0 %v493_v14 }
  0x41   :  { %465 = vmatmul.mubr.msk.f32.vlgmr.msra.gmra.mrb[2].mxu1 %vm67_vm0, %v62_v15  ;;  %p589_p0 = pnand %p588_p13, %p582_p10 }
 0x110   :  { %v459_v16 = vpop.f32.mrb[0].mxu1 }
 0x111   :  { %v140_v17 = vpop.f32.mrb[1].mxu1 }
 0x112   :  { %475 = vmatprep.mubr.msk.f32.mxu0 %vm241_vm1, %v140_v17 }
 0x113   :  { %476 = vmatmul.mubr.msk.f32.vlgmr.msra.gmra.mrb[0].mxu0 %vm241_vm1, %v459_v16 }
 0x114   :  { %v466_v18 = vpop.f32.mrb[2].mxu1 }
 0x115   :  { %v221_v19 = vpop.f32.mrb[3].mxu1 }
 0x116   :  { %478 = vmatprep.mubr.msk.f32.mxu0 %vm241_vm1, %v221_v19 }
 0x117   :  { %479 = vmatmul.mubr.msk.f32.gmra.mrb[2].mxu0 %vm241_vm1, %v466_v18 }
 0x1e6   :  { %v477_v21 = vpop.f32.mrb[0].mxu0 }
 0x1e7   :  { %v320_v22 = vpop.f32.mrb[1].mxu0  ;;  %v326_v24 = vadd.f32 %v477_v21, %v432_v20 }
 0x1e8   :  { %v321_v23 = vadd.f32 %v432_v20, %v320_v22 }
 0x1e9   :  { %v340_v30 = vmul.f32 %v326_v24, %v326_v24 }
 0x1ea   :  { %v480_v25 = vpop.f32.mrb[2].mxu0  ;;  %v339_v26 = vmul.f32 %v321_v23, %v321_v23 }
 0x1eb   :  { %v330_v27 = vpop.f32.mrb[3].mxu0  ;;  %v336_v29 = vadd.f32 %v480_v25, %v432_v20 }
 0x1ec   :  { %v331_v28 = vadd.f32 %v432_v20, %v330_v27  ;;  %343 = vadd.xlane.f32.xlu0 %v339_v26 }
 0x1ed   :  { %v342_v32 = vmul.f32 %v336_v29, %v336_v29 }
 0x1ee   :  { %v341_v31 = vmul.f32 %v331_v28, %v331_v28 }
 0x1f0   :  { %345 = vadd.xlane.f32.xlu0 %v340_v30  ;;  %347 = vadd.xlane.f32.xlu1 %v341_v31 }
 0x1f4   :  { %349 = vadd.xlane.f32.xlu1 %v342_v32 }
 0x279   :  { %v344_v33 = vpop.xlane.xlu0 %343 }
 0x27a   :  { %v351_v34 = vmax.f32 %v344_v33, 1e-24 }
 0x27c   :  { %503 = vrsqrt.f32 %v351_v34 }
 0x27d   :  { %v346_v35 = vpop.xlane.xlu0 %345  ;;  %v348_v36 = vpop.xlane.xlu1 %347 }
 0x27e   :  { %v352_v37 = vmax.f32 %v346_v35, 1e-24  ;;  %v353_v38 = vmax.f32 %v348_v36, 1e-24 }
 0x280   :  { %505 = vrsqrt.f32 %v352_v37 }
 0x281   :  { %507 = vrsqrt.f32 %v353_v38  ;;  %v350_v39 = vpop.xlane.xlu1 %349 }
 0x282   :  { %v354_v40 = vmax.f32 %v350_v39, 1e-24 }
 0x284   :  { %509 = vrsqrt.f32 %v354_v40 }
 0x286   :  { %v504_v41 = vpop.eup %503 }
 0x287   :  { %v359_v43 = vmul.f32 %v504_v41, %v321_v23 }
 0x289   :  { %v363_v48 = vmax.f32 %v359_v43, 0.0 }
 0x28a   :  { %v506_v42 = vpop.eup %505 }
 0x28b   :  { %v508_v44 = vpop.eup %507  ;;  %v360_v46 = vmul.f32 %v506_v42, %v326_v24 }
 0x28c   :  { %v361_v45 = vmul.f32 %v508_v44, %v331_v28 }
 0x28d   :  { %v364_v52 = vmax.f32 %v360_v46, 0.0 }
 0x28e   :  { %v510_v47 = vpop.eup %509  ;;  %v365_v49 = vmax.f32 %v361_v45, 0.0 }
 0x28f   :  { %v362_v50 = vmul.f32 %v510_v47, %v336_v29 }
 0x290   :  { %v367_v51 = vadd.f32 %v365_v49, %v363_v48 }
 0x291   :  { %v366_v53 = vmax.f32 %v362_v50, 0.0 }
 0x292   :  { %368 = vadd.xlane.f32.xlu0 %v367_v51 }
 0x293   :  { %v370_v54 = vadd.f32 %v366_v53, %v364_v52 }
 0x295   :  { %371 = vadd.xlane.f32.xlu1 %v370_v54 }
 0x31f   :  { %v369_v57 = vpop.xlane.xlu0 %368 }
 0x320   :  { %v373_v58 = vmul.f32 0.015625, %v369_v57 }
 0x322   :  { %v375_v59 = vsub.f32 %v363_v48, %v373_v58  ;;  %v377_v60 = vsub.f32 %v365_v49, %v373_v58  ;;  %v372_v61 = vpop.xlane.xlu1 %371 }
 0x323   :  { %v374_v62 = vmul.f32 0.015625, %v372_v61 }
 0x324   :  { %v382_v63 = vsel %vm381_vm2, %v375_v59, 0.0  ;;  %v384_v0 = vsel %vm381_vm2, %v377_v60, 0.0 }
 0x325   :  { %v376_v1 = vsub.f32 %v364_v52, %v374_v62  ;;  %v378_v2 = vsub.f32 %v366_v53, %v374_v62  ;;  %v386_v3 = vmul.f32 %v382_v63, %v382_v63  ;;  %v388_v4 = vmul.f32 %v384_v0, %v384_v0 }
 0x327   :  { %v390_v5 = vadd.f32 %v388_v4, %v386_v3  ;;  %v383_v6 = vsel %vm381_vm2, %v376_v1, 0.0  ;;  %v385_v7 = vsel %vm381_vm2, %v378_v2, 0.0 }
 0x328   :  { %v387_v8 = vmul.f32 %v383_v6, %v383_v6  ;;  %v389_v9 = vmul.f32 %v385_v7, %v385_v7 }
 0x329   :  { %391 = vadd.xlane.f32.xlu0 %v390_v5 }
 0x32a   :  { %v393_v10 = vadd.f32 %v389_v9, %v387_v8 }
 0x32c   :  { %394 = vadd.xlane.f32.xlu1 %v393_v10 }
 0x3b6   :  { %v392_v11 = vpop.xlane.xlu0 %391 }
 0x3b7   :  { %v396_v12 = vmul.f32 0.015625, %v392_v11 }
 0x3b9   :  { %v398_v13 = vadd.f32 1e-05, %v396_v12  ;;  %v395_v14 = vpop.xlane.xlu1 %394 }
 0x3ba   :  { %v397_v15 = vmul.f32 0.015625, %v395_v14 }
 0x3bb   :  { %511 = vrsqrt.f32 %v398_v13 }
 0x3bc   :  { %v399_v16 = vadd.f32 1e-05, %v397_v15 }
 0x3be   :  { %513 = vrsqrt.f32 %v399_v16 }
 0x3c5   :  { %v512_v17 = vpop.eup %511 }
 0x3c6   :  { %v402_v18 = vmul.f32 %v512_v17, %v375_v59  ;;  %v404_v19 = vmul.f32 %v512_v17, %v377_v60 }
 0x3c8   :  { %v514_v20 = vpop.eup %513  ;;  %406 = vst [vmem:[#allocation8] sm:$0xff] %v402_v18  ;;  %408 = vst [vmem:[#allocation8 + $0x10] sm:$0xff] %v404_v19 }
 0x3c9   :  { %v403_v21 = vmul.f32 %v514_v20, %v376_v1  ;;  %v405_v22 = vmul.f32 %v514_v20, %v378_v2 }
 0x3cb   :  { %407 = vst [vmem:[#allocation8 + $0x8] sm:$0xff] %v403_v21  ;;  %409 = vst [vmem:[#allocation8 + $0x18] sm:$0xff] %v405_v22 }
 0x3cc   :  { %592 = shalt.err (!%p589_p0)
}
 0x3cd   :  { %s593_s6 = scalar_lea.hbm %s718_s4, 512 }
 0x3ce   :  { %p594_p1 = scmp.ne.s32.totalorder %s718_s4, %s593_s6  ;;  %p597_p2 = scmp.lt.u32.totalorder %s593_s6, %s718_s4 }
 0x3d0   :  { %p599_p3 = pnand %p597_p2, %p594_p1 }
 0x3d2   :  { %602 = shalt.err (!%p599_p3)
}
 0x3d3   :  { %421 = dma.vmem_to_hbm [thread:$0]  %s416_s26, 512, %s718_s4, [#allocation4], %s611_s27, %s611_s27, %s612_s28  }
 0x3d4   :  { %607 = dma.done.wait [#allocation4], 512  }
 0x3d5   :  { %608 = vsyncadd [#allocation4], 4294966784 }
 0x3d6   :  { %425 = vsyncpa [#allocation3], 1 }
 0x3d7   :  { %426 = vsyncpa [#allocation6], 1 }
 0x3d8   :  { %427 = vsyncpa [#allocation4], 1 }

</bundles_post_ra>
